<compile_context>
chip_gen: v6e
topology: v6e:2x2x1
jax: 0.10.0
libtpu: 0.0.40
codegen_flags: <defaults>
</compile_context>

<pallas_src>
import jax
import jax.numpy as jnp
from jax.experimental import pallas as pl
from jax.experimental.pallas import tpu as pltpu

_CHUNK = 128   # lanes per vreg column
_GROUP = 4     # chunks combined per accumulator read-modify-write


def _vmem_limit_bytes():
    """Generation-aware scoped-VMEM limit: ~3/4 of physical, <= 100 MiB."""
    cap = 64 * 1024 * 1024  # conservative fallback (v7x per-core VMEM)
    try:
        info = pltpu.get_tpu_info()
        cap = int(getattr(info, "vmem_capacity_bytes", cap)) or cap
    except Exception:  # not on TPU / API unavailable: keep the fallback
        pass
    return min((cap * 3) // 4, 100 * 1024 * 1024)


def _pick_batch_tile(B):
    """Largest batch tile <= 8 dividing B that still leaves >= 2 batch tiles,
    so the 'parallel' grid axis can be sharded across v7x's two TensorCores."""
    if B % 8 == 0 and B >= 16:
        return 8
    for tb in (8, 4, 2, 1):
        if B % tb == 0 and B // tb >= 2:
            return tb
    return B  # B == 1


def channel_attention(x, w1, w2):
    """x: [B, C, H, W] (NCHW); w1: [C, C//r]; w2: [C//r, C] -> [B, C, 1, 1]."""
    B, C, H, W = x.shape
    HW = H * W
    x3 = x.reshape(B, C, HW)  # free view: merge spatial dims

    dtype_bytes = jnp.dtype(x.dtype).itemsize
    w_bytes = (w1.size * jnp.dtype(w1.dtype).itemsize
               + w2.size * jnp.dtype(w2.dtype).itemsize)
    vmem_limit = _vmem_limit_bytes()
    hw_pad = pl.cdiv(HW, _CHUNK) * _CHUNK

    # ---- tiling decisions (static) --------------------------------------
    # VMEM accounting: 2x double-buffered input block + 2x (block-invariant)
    # weight buffers + 2x f32 lane-resident accumulators + margin for the tiny
    # output blocks / semaphores / compiler-internal scratch.
    margin = 2 * 1024 * 1024
    max_block_bytes = 16 * 1024 * 1024  # per input buffer; amortizes step cost

    def lanes_for(tb):
        acc_bytes = 2 * tb * C * _CHUNK * 4
        budget = vmem_limit - margin - 2 * w_bytes - acc_bytes
        per_lane_col = tb * C * dtype_bytes
        if budget <= 0:
            return 0
        by_budget = (budget // 2) // per_lane_col     # 2-deep double buffering
        by_cap = max_block_bytes // per_lane_col
        return (min(by_budget, by_cap) // _CHUNK) * _CHUNK

    TB = _pick_batch_tile(B)
    # If TB*C is so large that even one 128-lane block busts the budget,
    # shrink the batch tile instead of overflowing vmem_limit_bytes.
    while TB > 1 and lanes_for(TB) < _CHUNK:
        nt = TB - 1
        while nt > 1 and B % nt != 0:
            nt -= 1
        TB = nt
    n_b = B // TB

    t_hw = int(max(_CHUNK, min(lanes_for(TB), hw_pad)))
    n_chunks = t_hw // _CHUNK
    n_hw = pl.cdiv(HW, t_hw)

    # Static description of the final (possibly ragged) HW block.
    last_start = (n_hw - 1) * t_hw
    tail_len = HW - last_start                     # in (0, t_hw]
    tail_chunks = pl.cdiv(tail_len, _CHUNK)
    tail_partial = (tail_len % _CHUNK) != 0
    tail_differs = (tail_chunks != n_chunks) or tail_partial

    inv_hw = 1.0 / float(HW)
    neg_inf = float("-inf")

    def kernel(x_ref, w1_ref, w2_ref, out_ref, acc_sum, acc_max):
        k = pl.program_id(1)

        @pl.when(k == 0)
        def _init():
            acc_sum[...] = jnp.zeros_like(acc_sum)
            acc_max[...] = jnp.full_like(acc_max, neg_inf)

        def accum_chunks(chunk0, n, mask_last, block_base):
            # One accumulator read-modify-write covering `n` consecutive
            # 128-lane chunks (cuts acc vld/vst traffic ~n x vs per-chunk).
            c_sum = None
            c_max = None
            for j in range(n):
                start = chunk0 * _CHUNK + j * _CHUNK
                if not isinstance(start, int):
                    start = pl.multiple_of(start, _CHUNK)
                c = x_ref[:, :, pl.ds(start, _CHUNK)].astype(jnp.float32)
                if mask_last and j == n - 1:
                    # Only the final (partial) chunk of the final block pays
                    # the iota + compare + selects.
                    lane = jax.lax.broadcasted_iota(
                        jnp.int32, (TB, C, _CHUNK), 2)
                    valid = (block_base + start + lane) < HW
                    cs = jnp.where(valid, c, 0.0)
                    cm = jnp.where(valid, c, neg_inf)
                else:
                    cs, cm = c, c
                c_sum = cs if c_sum is None else c_sum + cs
                c_max = cm if c_max is None else jnp.maximum(c_max, cm)
            acc_sum[...] = acc_sum[...] + c_sum
            acc_max[...] = jnp.maximum(acc_max[...], c_max)

        def process_block(valid_chunks, partial_last, block_base):
            # All arguments are static Python values.
            if partial_last:
                tail_n = valid_chunks % _GROUP or _GROUP
            else:
                tail_n = valid_chunks % _GROUP
            head_chunks = valid_chunks - tail_n
            head_groups = head_chunks // _GROUP
            if head_groups > 0:
                if head_groups <= 4:
                    for g in range(head_groups):
                        accum_chunks(g * _GROUP, _GROUP, False, 0)
                else:
                    # Long steady-state loop: partially-unrolled fori_loop so
                    # live ranges stay bounded (no static mega-unroll/spills).
                    def body(g, carry):
                        accum_chunks(g * _GROUP, _GROUP, False, 0)
                        return carry
                    jax.lax.fori_loop(0, head_groups, body, 0, unroll=4)
            if tail_n > 0:
                accum_chunks(head_chunks, tail_n, partial_last, block_base)

        if n_hw == 1:
            process_block(tail_chunks, tail_partial, 0)
        elif tail_differs:
            @pl.when(k < pl.num_programs(1) - 1)
            def _steady():
                process_block(n_chunks, False, 0)

            @pl.when(k == pl.num_programs(1) - 1)
            def _tail():
                process_block(tail_chunks, tail_partial, last_start)
        else:
            process_block(n_chunks, False, 0)

        @pl.when(k == pl.num_programs(1) - 1)
        def _finalize():
            w1v = w1_ref[...].astype(jnp.float32)
            w2v = w2_ref[...].astype(jnp.float32)
            # Single cross-lane (XLU) reduce in the epilogue.
            avg = jnp.sum(acc_sum[...], axis=-1) * inv_hw   # (TB, C)
            mx = jnp.max(acc_max[...], axis=-1)             # (TB, C)

            def mlp(feat):
                h = jnp.maximum(
                    jnp.dot(feat, w1v, preferred_element_type=jnp.float32),
                    0.0)
                return jnp.dot(h, w2v, preferred_element_type=jnp.float32)

            # TODO(synk): avg/max could be stacked along sublanes into one
            # (2*TB, C) MXU pass, but a TB-offset sublane concat is not a
            # guaranteed Mosaic lowering; kept as two tiny epilogue matmuls.
            z = mlp(avg) + mlp(mx)
            out = pl.reciprocal(1.0 + jnp.exp(-z))  # exact sigmoid
            out_ref[...] = out[None].astype(out_ref.dtype)

    out = pl.pallas_call(
        kernel,
        out_shape=jax.ShapeDtypeStruct((n_b, TB, C), jnp.float32),
        grid_spec=pltpu.PrefetchScalarGridSpec(
            num_scalar_prefetch=0,
            grid=(n_b, n_hw),
            in_specs=[
                pl.BlockSpec((TB, C, t_hw), lambda b, k: (b, 0, k)),
                pl.BlockSpec(w1.shape, lambda b, k: (0, 0)),  # block-invariant
                pl.BlockSpec(w2.shape, lambda b, k: (0, 0)),
            ],
            out_specs=pl.BlockSpec((1, TB, C), lambda b, k: (b, 0, 0)),
            scratch_shapes=[
                pltpu.VMEM((TB, C, _CHUNK), jnp.float32),  # running sum
                pltpu.VMEM((TB, C, _CHUNK), jnp.float32),  # running max
            ],
        ),
        compiler_params=pltpu.CompilerParams(
            dimension_semantics=("parallel", "arbitrary"),
            vmem_limit_bytes=vmem_limit,
        ),
    )(x3, w1, w2)

    return out.reshape(B, C, 1, 1)


if __name__ == "__main__":
    # Small shapes consistent with the module.
    B, C, H, W = 2, 4, 16, 16
    ratio = 2
    Cr = C // ratio

    key = jax.random.PRNGKey(0)
    kx, k1, k2 = jax.random.split(key, 3)

    x = jax.random.normal(kx, (B, C, H, W), dtype=jnp.float32)
    # PyTorch Conv2d weights would be [Cr, C, 1, 1] and [C, Cr, 1, 1];
    # stored here transposed & squeezed as dense matrices.
    w1 = jax.random.normal(k1, (C, Cr), dtype=jnp.float32) * 0.1
    w2 = jax.random.normal(k2, (Cr, C), dtype=jnp.float32) * 0.1

    out = channel_attention(x, w1, w2)
    out = jax.block_until_ready(out)

    # Pure-JAX reference of the same math.
    avg = jnp.mean(x, axis=(2, 3))
    mx = jnp.max(x, axis=(2, 3))
    ref = jax.nn.sigmoid(
        jnp.maximum(avg @ w1, 0.0) @ w2 + jnp.maximum(mx @ w1, 0.0) @ w2
    ).reshape(B, C, 1, 1)
    assert out.shape == (B, C, 1, 1)
    assert jnp.allclose(out, ref, atol=1e-5), "mismatch vs reference"

    print("KERNEL_OK")
</pallas_src>

<mosaic_0001>
module attributes {stable_mosaic.version = 11 : i64} {
  func.func @kernel(%arg0: i32, %arg1: i32, %arg2: memref<1x4x256xf32, #tpu.memory_space<vmem>>, %arg3: memref<4x2xf32, #tpu.memory_space<vmem>>, %arg4: memref<2x4xf32, #tpu.memory_space<vmem>>, %arg5: memref<1x1x4xf32, #tpu.memory_space<vmem>>, %arg6: memref<1x4x128xf32, #tpu.memory_space<vmem>>, %arg7: memref<1x4x128xf32, #tpu.memory_space<vmem>>) attributes {dimension_semantics = [#tpu.dimension_semantics<parallel>, #tpu.dimension_semantics<arbitrary>], iteration_bounds = array<i64: 2, 1>, scalar_prefetch = 0 : i64, scratch_operands = 2 : i64, tpu.core_type = #tpu.core_type<tc>, window_params = [{transform_indices = @transform_0, window_bounds = array<i64: 1, 4, 256>}, {pipeline_mode = #tpu.pipeline_mode<synchronous>, transform_indices = @transform_1, window_bounds = array<i64: 4, 2>}, {pipeline_mode = #tpu.pipeline_mode<synchronous>, transform_indices = @transform_2, window_bounds = array<i64: 2, 4>}, {transform_indices = @transform_3, window_bounds = array<i64: 1, 1, 4>}]} {
    %c0_i32 = arith.constant 0 : i32
    %0 = arith.cmpi eq, %arg1, %c0_i32 : i32
    %1 = arith.extui %0 : i1 to i32
    %c0_i32_0 = arith.constant 0 : i32
    %2 = arith.cmpi ne, %1, %c0_i32_0 : i32
    scf.if %2 {
      %cst = arith.constant 0.000000e+00 : f32
      %16 = vector.broadcast %cst : f32 to vector<1x4x128xf32>
      %c0_19 = arith.constant 0 : index
      %c0_20 = arith.constant 0 : index
      %c0_21 = arith.constant 0 : index
      %17 = vector.load %arg6[%c0_19, %c0_20, %c0_21] : memref<1x4x128xf32, #tpu.memory_space<vmem>>, vector<1x4x128xf32>
      tpu.vector_store %arg6[%c0_19, %c0_20, %c0_21], %16 {strides = array<i32>} : memref<1x4x128xf32, #tpu.memory_space<vmem>>, vector<1x4x128xf32>,
      %cst_22 = arith.constant 0xFF800000 : f32
      %18 = vector.broadcast %cst_22 : f32 to vector<1x4x128xf32>
      %c0_23 = arith.constant 0 : index
      %c0_24 = arith.constant 0 : index
      %c0_25 = arith.constant 0 : index
      %19 = vector.load %arg7[%c0_23, %c0_24, %c0_25] : memref<1x4x128xf32, #tpu.memory_space<vmem>>, vector<1x4x128xf32>
      tpu.vector_store %arg7[%c0_23, %c0_24, %c0_25], %18 {strides = array<i32>} : memref<1x4x128xf32, #tpu.memory_space<vmem>>, vector<1x4x128xf32>,
    } else {
    }
    %c0 = arith.constant 0 : index
    %c0_1 = arith.constant 0 : index
    %c0_2 = arith.constant 0 : index
    %3 = vector.load %arg2[%c0, %c0_1, %c0_2] : memref<1x4x256xf32, #tpu.memory_space<vmem>>, vector<1x4x128xf32>
    %c0_3 = arith.constant 0 : index
    %c0_4 = arith.constant 0 : index
    %c128 = arith.constant 128 : index
    %4 = vector.load %arg2[%c0_3, %c0_4, %c128] : memref<1x4x256xf32, #tpu.memory_space<vmem>>, vector<1x4x128xf32>
    %5 = arith.addf %3, %4 : vector<1x4x128xf32>
    %6 = arith.maximumf %3, %4 : vector<1x4x128xf32>
    %c0_5 = arith.constant 0 : index
    %c0_6 = arith.constant 0 : index
    %c0_7 = arith.constant 0 : index
    %7 = vector.load %arg6[%c0_5, %c0_6, %c0_7] : memref<1x4x128xf32, #tpu.memory_space<vmem>>, vector<1x4x128xf32>
    %8 = arith.addf %7, %5 : vector<1x4x128xf32>
    %c0_8 = arith.constant 0 : index
    %c0_9 = arith.constant 0 : index
    %c0_10 = arith.constant 0 : index
    %9 = vector.load %arg6[%c0_8, %c0_9, %c0_10] : memref<1x4x128xf32, #tpu.memory_space<vmem>>, vector<1x4x128xf32>
    tpu.vector_store %arg6[%c0_8, %c0_9, %c0_10], %8 {strides = array<i32>} : memref<1x4x128xf32, #tpu.memory_space<vmem>>, vector<1x4x128xf32>,
    %c0_11 = arith.constant 0 : index
    %c0_12 = arith.constant 0 : index
    %c0_13 = arith.constant 0 : index
    %10 = vector.load %arg7[%c0_11, %c0_12, %c0_13] : memref<1x4x128xf32, #tpu.memory_space<vmem>>, vector<1x4x128xf32>
    %11 = arith.maximumf %10, %6 : vector<1x4x128xf32>
    %c0_14 = arith.constant 0 : index
    %c0_15 = arith.constant 0 : index
    %c0_16 = arith.constant 0 : index
    %12 = vector.load %arg7[%c0_14, %c0_15, %c0_16] : memref<1x4x128xf32, #tpu.memory_space<vmem>>, vector<1x4x128xf32>
    tpu.vector_store %arg7[%c0_14, %c0_15, %c0_16], %11 {strides = array<i32>} : memref<1x4x128xf32, #tpu.memory_space<vmem>>, vector<1x4x128xf32>,
    %c0_i32_17 = arith.constant 0 : i32
    %13 = arith.cmpi eq, %arg1, %c0_i32_17 : i32
    %14 = arith.extui %13 : i1 to i32
    %c0_i32_18 = arith.constant 0 : i32
    %15 = arith.cmpi ne, %14, %c0_i32_18 : i32
    scf.if %15 {
      %c0_19 = arith.constant 0 : index
      %c0_20 = arith.constant 0 : index
      %16 = vector.load %arg3[%c0_19, %c0_20] : memref<4x2xf32, #tpu.memory_space<vmem>>, vector<4x2xf32>
      %c0_21 = arith.constant 0 : index
      %c0_22 = arith.constant 0 : index
      %17 = vector.load %arg4[%c0_21, %c0_22] : memref<2x4xf32, #tpu.memory_space<vmem>>, vector<2x4xf32>
      %c0_23 = arith.constant 0 : index
      %c0_24 = arith.constant 0 : index
      %c0_25 = arith.constant 0 : index
      %18 = vector.load %arg6[%c0_23, %c0_24, %c0_25] : memref<1x4x128xf32, #tpu.memory_space<vmem>>, vector<1x4x128xf32>
      %cst = arith.constant dense<0.000000e+00> : vector<1x4xf32>
      %19 = vector.multi_reduction <add>, %18, %cst [2] : vector<1x4x128xf32> to vector<1x4xf32>
      %cst_26 = arith.constant 3.906250e-03 : f32
      %20 = vector.broadcast %cst_26 : f32 to vector<1x4xf32>
      %21 = arith.mulf %19, %20 : vector<1x4xf32>
      %c0_27 = arith.constant 0 : index
      %c0_28 = arith.constant 0 : index
      %c0_29 = arith.constant 0 : index
      %22 = vector.load %arg7[%c0_27, %c0_28, %c0_29] : memref<1x4x128xf32, #tpu.memory_space<vmem>>, vector<1x4x128xf32>
      %cst_30 = arith.constant dense<0xFF800000> : vector<1x4xf32>
      %23 = vector.multi_reduction <maximumf>, %22, %cst_30 [2] : vector<1x4x128xf32> to vector<1x4xf32>
      %cst_31 = arith.constant dense<0.000000e+00> : vector<1x2xf32>
      %24 = tpu.matmul %21, %16, %cst_31 {dimension_numbers = #tpu.dot_dimension_numbers<[1], [0], [0], [1], [0, 0, 1, 1], [], []>} : vector<1x4xf32>, vector<4x2xf32>, vector<1x2xf32> -> vector<1x2xf32>
      %cst_32 = arith.constant 0.000000e+00 : f32
      %25 = vector.broadcast %cst_32 : f32 to vector<1x2xf32>
      %26 = arith.maximumf %24, %25 : vector<1x2xf32>
      %cst_33 = arith.constant dense<0.000000e+00> : vector<1x4xf32>
      %27 = tpu.matmul %26, %17, %cst_33 {dimension_numbers = #tpu.dot_dimension_numbers<[1], [0], [0], [1], [0, 0, 1, 1], [], []>} : vector<1x2xf32>, vector<2x4xf32>, vector<1x4xf32> -> vector<1x4xf32>
      %cst_34 = arith.constant dense<0.000000e+00> : vector<1x2xf32>
      %28 = tpu.matmul %23, %16, %cst_34 {dimension_numbers = #tpu.dot_dimension_numbers<[1], [0], [0], [1], [0, 0, 1, 1], [], []>} : vector<1x4xf32>, vector<4x2xf32>, vector<1x2xf32> -> vector<1x2xf32>
      %cst_35 = arith.constant 0.000000e+00 : f32
      %29 = vector.broadcast %cst_35 : f32 to vector<1x2xf32>
      %30 = arith.maximumf %28, %29 : vector<1x2xf32>
      %cst_36 = arith.constant dense<0.000000e+00> : vector<1x4xf32>
      %31 = tpu.matmul %30, %17, %cst_36 {dimension_numbers = #tpu.dot_dimension_numbers<[1], [0], [0], [1], [0, 0, 1, 1], [], []>} : vector<1x2xf32>, vector<2x4xf32>, vector<1x4xf32> -> vector<1x4xf32>
      %32 = arith.addf %27, %31 : vector<1x4xf32>
      %cst_37 = arith.constant 0.000000e+00 : f32
      %33 = vector.broadcast %cst_37 : f32 to vector<1x4xf32>
      %34 = arith.subf %33, %32 : vector<1x4xf32>
      %35 = math.exp %34 : vector<1x4xf32>
      %cst_38 = arith.constant 1.000000e+00 : f32
      %36 = vector.broadcast %cst_38 : f32 to vector<1x4xf32>
      %37 = arith.addf %36, %35 : vector<1x4xf32>
      %38 = tpu.reciprocal %37 : vector<1x4xf32> -> vector<1x4xf32>
      %39 = vector.shape_cast %38 : vector<1x4xf32> to vector<1x1x4xf32>
      %c0_39 = arith.constant 0 : index
      %c0_40 = arith.constant 0 : index
      %c0_41 = arith.constant 0 : index
      %40 = vector.load %arg5[%c0_39, %c0_40, %c0_41] : memref<1x1x4xf32, #tpu.memory_space<vmem>>, vector<1x1x4xf32>
      tpu.vector_store %arg5[%c0_39, %c0_40, %c0_41], %39 {strides = array<i32>} : memref<1x1x4xf32, #tpu.memory_space<vmem>>, vector<1x1x4xf32>,
    } else {
    }
    return
  }
  func.func @transform_0(%arg0: i32, %arg1: i32) -> (i32, i32, i32) {
    %c0_i32 = arith.constant 0 : i32
    %c0_i32_0 = arith.constant 0 : i32
    return %arg0, %c0_i32, %arg1 : i32, i32, i32
  }
  func.func @transform_1(%arg0: i32, %arg1: i32) -> (i32, i32) {
    %c0_i32 = arith.constant 0 : i32
    %c0_i32_0 = arith.constant 0 : i32
    %c0_i32_1 = arith.constant 0 : i32
    return %c0_i32, %c0_i32_0 : i32, i32
  }
  func.func @transform_2(%arg0: i32, %arg1: i32) -> (i32, i32) {
    %c0_i32 = arith.constant 0 : i32
    %c0_i32_0 = arith.constant 0 : i32
    %c0_i32_1 = arith.constant 0 : i32
    return %c0_i32, %c0_i32_0 : i32, i32
  }
  func.func @transform_3(%arg0: i32, %arg1: i32) -> (i32, i32, i32) {
    %c0_i32 = arith.constant 0 : i32
    %c0_i32_0 = arith.constant 0 : i32
    %c0_i32_1 = arith.constant 0 : i32
    return %arg0, %c0_i32, %c0_i32_0 : i32, i32, i32
  }
}

</mosaic_0001>

<bundles_post_ra>
// kernel: tpu_custom_call.1
= control target key start
LH: loop header
LB: loop body
LE: loop exit
PB: predicated region body
PF: predicated region fallthrough
CT: control target
= control target key end

     0   :  { %8 = vsyncpa [#allocation5], 0  ;;  %s1048_s0 = inlined_call_operand.hbm [shape: f32[2,4,256], index: 0, kind: input, shape index: {}]   ;;  %s1049_s1 = inlined_call_operand.vmem [shape: f32[4,2], index: 1, kind: input, shape index: {}]   ;;  %s1050_s2 = inlined_call_operand.vmem [shape: f32[2,4], index: 2, kind: input, shape index: {}]   ;;  %s1051_s3 = inlined_call_operand.hbm [shape: f32[2,1,4], index: 3, kind: output, shape index: {}]  }
   0x1   :  { %10 = vsyncpa [#allocation5 + $0x1], 0 }
   0x2   :  { %11 = vsyncpa [#allocation6], 0 }
   0x3   :  { %13 = vsyncpa [#allocation6 + $0x1], 0  ;;  %s897_s12 = smov 0   ;;  %s899_s13 = smov 0  }
   0x4   :  { %s901_s14 = smov 0   ;;  %s903_s15 = smov 0  }
   0x5   :  { %s905_s16 = smov 0   ;;  %s907_s17 = smov 0  }
   0x6 LB: > { %s644_s18 = sadd.s32 4294967295, %s870_s17   ;;  %s645_s19 = sadd.s32 4294967294, %s870_s17   ;;  %s870_s17 = sphi %s907_s17, %s19_s17   ;;  %s866_s16 = sphi %s905_s16, %s1063_s16   ;;  %s862_s15 = sphi %s903_s15, %s1062_s15   ;;  %s858_s14 = sphi %s901_s14, %s1061_s14   ;;  %s854_s13 = sphi %s899_s13, %s1060_s13   ;;  %s850_s12 = sphi %s897_s12, %s1059_s12  }
   0x7   : > { %s31_s20 = sadd.s32 1, %s866_s16  ;;  %s40_s21 = sadd.s32 1, %s858_s14 }
   0x8   : > { %p33_p0 = scmp.ge.s32.totalorder %s31_s20, 2  ;;  %p47_p1 = scmp.ne.s32.totalorder %s858_s14, %s854_s13 }
   0x9   : > { %p48_p2 = scmp.eq.s32.totalorder %s870_s17, 0  ;;  %p53_p3 = scmp.ne.s32.totalorder %s854_s13, %s850_s12 }
   0xa   : > { %s1065_s20 = smov (%p33_p0, %s31_s20), 0  ;;  %p54_p5 = scmp.eq.s32.totalorder %s644_s18, 0 }
   0xb   : > { %p938_p4 = por %p48_p2, %p47_p1  ;;  %s35_s23 = ssub.s32 %s866_s16, %s1065_s20 }
   0xc   : > { %p119_p6 = scmp.eq.s32.totalorder %s644_s18, 1  ;;  %p38_p7 = scmp.eq.s32.totalorder %s35_s23, 0 }
   0xd   : > { %p944_p8 = por %p54_p5, %p53_p3  ;;  %p125_p10 = scmp.eq.s32.totalorder %s645_s19, 1 }
   0xe   : > { %p948_p9 = por %p119_p6, %p47_p1  ;;  %p705_p13 = scmp.lt.s32.totalorder %s870_s17, 2 }
   0xf   : > { %s953_s26 = scalar_select %p38_p7, %s858_s14, %s40_s21  }
  0x10   : > { %p955_p11 = por %p125_p10, %p53_p3  ;;  %s151_s28 = sand.u32 1, %s858_s14  }
  0x11   : > { %s648_s29 = sshll.u32 %s151_s28, 3  ;;  %s664_s30 = sshll.u32 %s866_s16, 7 }
  0x12   : > { %s1055_s27 = scalar_select %p955_p11, 1, 0 }
  0x13   : > { %s163_s6 = scalar_lea.hbm %s1048_s0, %s664_s30  ;;  %s155_s7 = scalar_lea.vmem [#allocation4], %s648_s29 }
  0x14   : > { %s165_s8 = sshll.u32 %s155_s7, 4  ;;  %p968_p0 = pnand %p705_p13, %p938_p4  ;;  %s166_s8 = int_to_ptr.vmem [resolvable:$true] %s165_s8 }
  0x15   : > { %p651_p1 = scmp.ge.s32.totalorder %s870_s17, 1  ;;  %p170_p2 = scmp.lt.s32.totalorder %s870_s17, 3 }
  0x16   : > { %s152_s10 = scalar_lea.sflag [#allocation5], %s151_s28  ;;  %p764_p3 = pneg %p968_p0 }
  0x17   : > { %s775_s11 = scalar_lea.vmem %s166_s8, 128  ;;  %s872_s18 = smov [#allocation4]  }
  0x18   : > { %p776_p5 = scmp.ne.s32.totalorder %s166_s8, %s775_s11  ;;  %s780_s19 = sshll.u32 %s872_s18, 4  ;;  %s781_s19 = int_to_ptr.vmem [resolvable:$false] %s780_s19 }
  0x19   : > { %s782_s21 = scalar_lea.vmem %s781_s19, 256  ;;  %p783_p10 = scmp.lt.s32.totalorder %s166_s8, %s781_s19 }
  0x1a   : > { %p778_p6 = pnand %p776_p5, %p764_p3  ;;  %p784_p12 = scmp.lt.s32.totalorder %s782_s21, %s775_s11 }
  0x1c   : > { %p779_p7 = pneg %p778_p6  ;;  %p785_p4 = por %p784_p12, %p783_p10 }
  0x1e   : > { %p786_p13 = pnand %p785_p4, %p779_p7 }
  0x20   : > { %789 = shalt.err (!%p786_p13)
}
  0x21   : > { %700 = dma.hbm_to_vmem [thread:$0]  (!%p968_p0), %s163_s6, 128, %s166_s8, %s152_s10  }
  0x22   : > { %p171_p11 = pnand %p651_p1, %p170_p2 }
  0x23   : > { %s983_s22 = sand.u32 (!%p171_p11), 1, %s854_s13  }
  0x24   : > { %174 = sbr.rel (%p171_p11) target bundleno = 643 (0x283), region = 32  ;;  %s652_s23 = sshll.u32 (!%p171_p11), %s983_s22, 3 }
  0x25   : > { %s177_s28 = scalar_lea.sflag (!%p171_p11), [#allocation5], %s983_s22  ;;  %s180_s29 = scalar_lea.vmem (!%p171_p11), [#allocation4], %s652_s23 }
  0x29   : > { %841 = dma.done.wait (%p944_p8), %s177_s28, 128  }
  0x2a   : > { %843 = vsyncadd (%p944_p8), %s177_s28, 4294967168  ;;  %v873_v0 = vmov 0.0   ;;  %v874_v1 = vmov -inf   ;;  %v209_v2 = vld [vmem:[%s180_s29] sm:$0xf]  ;;  %vm225_vm0 = vcmask 1043456   ;;  %v235_v15 = vlaneseq }
  0x2b   : > { %207 = vst [vmem:[#allocation2] sm:$0xf] %v873_v0  ;;  %208 = vst [vmem:[#allocation3] sm:$0xf] %v874_v1  ;;  %673 = vmatprep.subr.mxu0 %v873_v0  ;;  %678 = vmatprep.subr.mxu1 %v873_v0  ;;  %v210_v3 = vld [vmem:[%s180_s29 + $0x4] sm:$0xf] }
  0x2c   : > { %v211_v4 = vadd.f32 %v210_v3, %v209_v2  ;;  %v212_v6 = vmax.f32 %v209_v2, %v210_v3  ;;  %v222_v14 = vld [vmem:[%s1049_s1] sm:$0xf]  ;;  %vm875_vm1 = vmmov 0   ;;  %v236_v16 = vand.u32 127, %v235_v15  ;;  %s661_s6 = sshll.u32 %s862_s15, 4  ;;  %s201_s7 = scalar_lea.vmem [#allocation7], %s983_s22 }
  0x2d   : > { %674 = vmatpush3.msk.msra.mxu0 %vm225_vm0, %v222_v14  ;;  %675 = vmatprep.mubr.msk.f32.mxu0 %vm875_vm1, %v873_v0  ;;  %v238_v17 = vshrl.u32 %v235_v15, 7  ;;  %vm241_vm2 = vcmask 31744   ;;  %v223_v24 = vld [vmem:[%s1050_s2] sm:$0x3]  ;;  %vm400_vm3 = vcmask 1041408   ;;  %vm396_vm4 = vcmask 15360   ;;  %s1006_s11 = scalar_lea.hbm %s1051_s3, %s661_s6 }
  0x2e   : > { %679 = vmatpush3.msk.msra.mxu1 %vm225_vm0, %v222_v14  ;;  %680 = vmatprep.mubr.msk.f32.mxu1 %vm875_vm1, %v873_v0  ;;  %s567_s8 = sshll.u32 %s201_s7, 4  ;;  %vm552_vm5 = vcmask 24576   ;;  %s555_s18 = scalar_lea.sflag [#allocation6], %s983_s22  ;;  %s568_s8 = int_to_ptr.vmem [resolvable:$true] %s567_s8 }
  0x2f   : > { %683 = vmatprep.subr.mxu0 %v873_v0  ;;  %688 = vmatprep.subr.mxu1 %v873_v0  ;;  %v239_v18 = vsub.s32 %v236_v16, %v238_v17  ;;  %s790_s19 = scalar_lea.vmem %s568_s8, 16  ;;  %s876_s21 = smov [#allocation7]  }
  0x30   : > { %p791_p8 = scmp.ne.s32.totalorder %s568_s8, %s790_s19  ;;  %s794_s23 = sshll.u32 %s876_s21, 4  ;;  %s795_s23 = int_to_ptr.vmem [resolvable:$false] %s794_s23 }
  0x31   : > { %s796_s15 = scalar_lea.vmem %s795_s23, 32  ;;  %p797_p0 = scmp.lt.s32.totalorder %s568_s8, %s795_s23 }
  0x32   : > { %v213_v5 = vld [vmem:[#allocation2] sm:$0xf]  ;;  %v216_v7 = vld [vmem:[#allocation3] sm:$0xf]  ;;  %p792_p11 = pnand %p791_p8, %p948_p9  ;;  %p798_p1 = scmp.lt.s32.totalorder %s796_s15, %s790_s19 }
  0x33   : > { %v214_v8 = vadd.f32 %v213_v5, %v211_v4  ;;  %v217_v9 = vmax.f32 %v216_v7, %v212_v6 }
  0x34   : > { %p793_p12 = pneg %p792_p11  ;;  %p799_p2 = por %p798_p1, %p797_p0 }
  0x35   : > { %215 = vst [vmem:[#allocation2] sm:$0xf] %v214_v8  ;;  %218 = vst [vmem:[#allocation3] sm:$0xf] %v217_v9 }
  0x36   : > { %p800_p3 = pnand %p799_p2, %p793_p12 }
  0x3c   : > { %v224_v10 = vld [vmem:[#allocation2] sm:$0xf]  ;;  %v230_v11 = vld [vmem:[#allocation3] sm:$0xf] }
  0x3d   : > { %v226_v12 = vsel %vm225_vm0, %v224_v10, 0.0  ;;  %v231_v13 = vsel %vm225_vm0, %v230_v11, -inf }
  0x3e   : > { %227 = vadd.xlane.f32.xlu0 %v226_v12 }
  0x42   : > { %232 = vmax.xlane.f32.xlu0 %v231_v13 }
  0xc7   : > { %v228_v19 = vpop.xlane.xlu0 %227 }
  0xc8   : > { %v229_v20 = vmul.f32 0.00390625, %v228_v19 }
  0xca   : > { %v240_v21 = vrot.slane %v229_v20, %v239_v18 }
  0xcb   : > { %v233_v22 = vpop.xlane.xlu0 %232 }
  0xcc   : > { %v322_v23 = vrot.slane %v233_v22, %v239_v18  ;;  %676 = vmatmul.mubr.msk.f32.vlgmr.msra.gmra.mxu0 %vm241_vm2, %v240_v21 }
  0xcd   : > { %685 = vmatprep.mubr.msk.f32.mxu0 %vm875_vm1, %v873_v0  ;;  %684 = vmatpush3.msk.msra.mxu0 %vm400_vm3, %v223_v24 }
  0xce   : > { %681 = vmatmul.mubr.msk.f32.vlgmr.msra.gmra.mxu1 %vm241_vm2, %v322_v23 }
  0xcf   : > { %690 = vmatprep.mubr.msk.f32.mxu1 %vm875_vm1, %v873_v0  ;;  %689 = vmatpush3.msk.msra.mxu1 %vm400_vm3, %v223_v24 }
 0x18c   : > { %v313_v25 = vpop.f32.mrf.mxu0 }
 0x18d   : > { %v317_v26 = vmax.f32 %v313_v25, 0.0 }
 0x18e   : > { %v677_v27 = vpop.f32.mrf.mxu0  ;;  %v391_v28 = vpop.f32.mrf.mxu1 }
 0x18f   : > { %v395_v29 = vmax.f32 %v391_v28, 0.0  ;;  %691 = vmatmul.mubr.msk.f32.vlgmr.msra.gmra.mxu1 %vm396_vm4, %v317_v26 }
 0x190   : > { %v682_v30 = vpop.f32.mrf.mxu1 }
 0x191   : > { %686 = vmatmul.mubr.msk.f32.vlgmr.msra.gmra.mxu0 %vm396_vm4, %v395_v29 }
 0x24f   : > { %v543_v31 = vpop.f32.mrf.mxu1 }
 0x251   : > { %v470_v32 = vpop.f32.mrf.mxu0  ;;  %v692_v33 = vpop.f32.mrf.mxu1 }
 0x252   : > { %v544_v34 = vadd.f32 %v543_v31, %v470_v32 }
 0x253   : > { %v687_v35 = vpop.f32.mrf.mxu0 }
 0x254   : > { %v547_v36 = vsub.f32 0.0, %v544_v34 }
 0x256   : > { %v548_v37 = vmul.f32 1.442695, %v547_v36 }
 0x258   : > { %758 = vpow2.f32 %v548_v37 }
 0x265   : > { %v759_v38 = vpop.eup %758 }
 0x266   : > { %v550_v39 = vadd.f32 1.0, %v759_v38 }
 0x268   : > { %760 = vrcp.f32 %v550_v39 }
 0x275   : > { %v761_v40 = vpop.eup %760 }
 0x276   : > { %553 = vst.msk [vmem:[%s201_s7] sm:$0x1] %vm552_vm5, %v761_v40 }
 0x277   : > { %803 = shalt.err (!%p800_p3)
}
 0x278   : > { %s804_s28 = scalar_lea.hbm %s1006_s11, 16  ;;  %s808_s24 = scalar_lea.hbm %s1051_s3, 32 }
 0x279   : > { %p805_p5 = scmp.ne.s32.totalorder %s1006_s11, %s804_s28  ;;  %p809_p10 = scmp.lt.s32.totalorder %s1006_s11, %s1051_s3 }
 0x27a   : > { %p810_p4 = scmp.lt.s32.totalorder %s808_s24, %s804_s28 }
 0x27b   : > { %p806_p6 = pnand %p805_p5, %p948_p9 }
 0x27c   : > { %p811_p13 = por %p810_p4, %p809_p10 }
 0x27d   : > { %p807_p7 = pneg %p806_p6 }
 0x27f   : > { %p812_p8 = pnand %p811_p13, %p807_p7 }
 0x281   : > { %815 = shalt.err (!%p812_p8)
}
 0x282   : > { %695 = dma.vmem_to_hbm [thread:$0]  (%p948_p9), %s568_s8, 16, %s1006_s11, %s555_s18  }
 0x283 PF: > { %s579_s5 = sand.u32 1, %s850_s12   ;;  %p1057_p11 = scmp.ne.s32.totalorder %s1055_s27, 0 }
 0x284   : > { %p1058_p12 = scmp.ge.s32.totalorder %s870_s17, 2  ;;  %s580_s6 = scalar_lea.sflag [#allocation6], %s579_s5 }
 0x286   : > { %p702_p0 = pnand %p1058_p12, %p1057_p11 }
 0x288   : > { %p703_p1 = pneg %p702_p0 }
 0x28a   : > { %845 = dma.done.wait (%p703_p1), %s580_s6, 16  }
 0x28b   : > { %847 = vsyncadd (%p703_p1), %s580_s6, 4294967280  ;;  %s19_s17 = sadd.s32 1, %s870_s17   ;;  %s1059_s12 = smov %s854_s13 }
 0x28c   : > { %p16_p2 = scmp.ge.s32.totalorder %s19_s17, 4   ;;  %s1060_s13 = smov %s858_s14 }
 0x28d   : > { %s1061_s14 = smov %s953_s26  ;;  %s1062_s15 = smov %s866_s16 }
 0x28e   : > { %s1063_s16 = smov %s1065_s20  ;;  %18 = sbr.rel (!%p16_p2) target bundleno = 6 (0x6), region = 85 }
 0x293   :  { %584 = vsyncpa [#allocation5], 1 }
 0x294   :  { %586 = vsyncpa [#allocation5 + $0x1], 1 }
 0x295   :  { %587 = vsyncpa [#allocation6], 1 }
 0x296   :  { %589 = vsyncpa [#allocation6 + $0x1], 1 }

</bundles_post_ra>
